<compile_context>
chip_gen: v5e
topology: v5e:2x2
jax: 0.10.0
libtpu: 0.0.40
codegen_flags: <defaults>
</compile_context>

<pallas_src>
import functools

import jax
import jax.numpy as jnp
from jax.experimental import pallas as pl
from jax.experimental.pallas import tpu as pltpu

BN_EPS = 1e-5
VMEM_LIMIT = 32 * 1024 * 1024


# ----------------------------------------------------------------------------
# in-kernel math helpers
# ----------------------------------------------------------------------------
def _gelu(x):
    # exact GELU (erf form, matches nn.GELU() default) via A&S 7.1.26,
    # |abs err| <= ~1.5e-7 for the erf; divide lowered to EUP reciprocal.
    z = x * 0.7071067811865476
    sgn = jnp.where(z >= 0.0, 1.0, -1.0)
    za = jnp.abs(z)
    t = pl.reciprocal(1.0 + 0.3275911 * za, approx=True)
    poly = ((((1.061405429 * t - 1.453152027) * t + 1.421413741) * t
             - 0.284496736) * t + 0.254829592) * t
    erf = sgn * (1.0 - poly * jnp.exp(-za * za))
    return 0.5 * x * (1.0 + erf)


# ----------------------------------------------------------------------------
# Pass 1: BatchNorm batch statistics -> per-channel (scale, shift)
# ----------------------------------------------------------------------------
def _stats_kernel(inv_n, x_ref, w1_ref, b1_ref, g_ref, be_ref,
                  scale_ref, shift_ref, s1_ref, s2_ref):
    i = pl.program_id(0)

    @pl.when(i == 0)
    def _():
        s1_ref[...] = jnp.zeros_like(s1_ref)
        s2_ref[...] = jnp.zeros_like(s2_ref)

    # h = x @ W1 + b1   (bf16 MXU operands, f32 accumulation)
    h = jnp.dot(x_ref[...].astype(jnp.bfloat16), w1_ref[...],
                preferred_element_type=jnp.float32) + b1_ref[...]
    s1_ref[...] += jnp.sum(h, axis=0, keepdims=True)
    s2_ref[...] += jnp.sum(h * h, axis=0, keepdims=True)

    @pl.when(i == pl.num_programs(0) - 1)
    def _():
        mu = s1_ref[...] * inv_n
        var = s2_ref[...] * inv_n - mu * mu          # biased var (train mode)
        rstd = jax.lax.rsqrt(var + BN_EPS)
        scale = g_ref[...] * rstd
        scale_ref[...] = scale
        shift_ref[...] = be_ref[...] - mu * scale


# ----------------------------------------------------------------------------
# Pass 2: normalize + GELU + second Linear + residual, tile-parallel
# ----------------------------------------------------------------------------
def _apply_kernel(x_ref, w1_ref, b1_ref, scale_ref, shift_ref,
                  w2_ref, b2_ref, o_ref):
    x = x_ref[...]
    h = jnp.dot(x.astype(jnp.bfloat16), w1_ref[...],
                preferred_element_type=jnp.float32) + b1_ref[...]
    hn = h * scale_ref[...] + shift_ref[...]          # folded BN
    g = _gelu(hn)                                     # f32 elementwise
    y = jnp.dot(g.astype(jnp.bfloat16), w2_ref[...],
                preferred_element_type=jnp.float32) + b2_ref[...]
    o_ref[...] = y + x                                # residual


# ----------------------------------------------------------------------------
# wrapper
# ----------------------------------------------------------------------------
def two_layer_nn_forward(x, w1, b1, gamma, beta, w2, b2, *, tile_rows=128):
    n_rows, c = x.shape
    hidden = w1.shape[1]
    assert n_rows % tile_rows == 0, "row count must be divisible by tile_rows"
    grid = (n_rows // tile_rows,)

    # cast weight matrices to bf16 once (halves weight DMA, MXU fast path)
    w1_bf = w1.astype(jnp.bfloat16)
    w2_bf = w2.astype(jnp.bfloat16)

    const = lambda shape: pl.BlockSpec(shape, lambda i: (0,) * len(shape))

    # ---- pass 1: batch statistics (reduction over row tiles) ----
    scale, shift = pl.pallas_call(
        functools.partial(_stats_kernel, 1.0 / n_rows),
        out_shape=(jax.ShapeDtypeStruct((1, hidden), jnp.float32),
                   jax.ShapeDtypeStruct((1, hidden), jnp.float32)),
        grid=grid,
        in_specs=[
            pl.BlockSpec((tile_rows, c), lambda i: (i, 0)),   # x tile
            const((c, hidden)),                               # W1 (bf16)
            const((1, hidden)),                               # b1
            const((1, hidden)),                               # gamma
            const((1, hidden)),                               # beta
        ],
        out_specs=(const((1, hidden)), const((1, hidden))),
        scratch_shapes=[pltpu.VMEM((1, hidden), jnp.float32),
                        pltpu.VMEM((1, hidden), jnp.float32)],
        compiler_params=pltpu.CompilerParams(
            dimension_semantics=("arbitrary",),
            vmem_limit_bytes=VMEM_LIMIT),
    )(x, w1_bf, b1, gamma, beta)

    # ---- pass 2: normalize + GELU + Linear + residual (row-parallel) ----
    out = pl.pallas_call(
        _apply_kernel,
        out_shape=jax.ShapeDtypeStruct((n_rows, c), jnp.float32),
        grid=grid,
        in_specs=[
            pl.BlockSpec((tile_rows, c), lambda i: (i, 0)),   # x tile
            const((c, hidden)),                               # W1 (bf16)
            const((1, hidden)),                               # b1
            const((1, hidden)),                               # scale
            const((1, hidden)),                               # shift
            const((hidden, c)),                               # W2 (bf16)
            const((1, c)),                                    # b2
        ],
        out_specs=pl.BlockSpec((tile_rows, c), lambda i: (i, 0)),
        compiler_params=pltpu.CompilerParams(
            dimension_semantics=("parallel",),
            vmem_limit_bytes=VMEM_LIMIT),
    )(x, w1_bf, b1, scale, shift, w2_bf, b2)
    return out


# ----------------------------------------------------------------------------
# pure-JAX reference (f32, exact erf GELU)
# ----------------------------------------------------------------------------
def two_layer_nn_ref(x, w1, b1, gamma, beta, w2, b2):
    h = x @ w1 + b1
    mu = h.mean(0, keepdims=True)
    var = ((h - mu) ** 2).mean(0, keepdims=True)           # biased (train mode)
    hn = (h - mu) / jnp.sqrt(var + BN_EPS) * gamma + beta
    return jax.nn.gelu(hn, approximate=False) @ w2 + b2 + x


if __name__ == "__main__":
    # x is (BN, C) as in the torch forward; shapes chosen lane-dense
    # (multiples of 128 on the last axis) per the performance review.
    N_ROWS, C, HIDDEN = 256, 128, 256

    key = jax.random.PRNGKey(0)
    kx, k1, k2, k3, k4, k5, k6 = jax.random.split(key, 7)
    x = jax.random.normal(kx, (N_ROWS, C), jnp.float32)
    w1 = 0.05 * jax.random.normal(k1, (C, HIDDEN), jnp.float32)
    b1 = 0.02 * jax.random.normal(k2, (1, HIDDEN), jnp.float32)
    gamma = 1.0 + 0.1 * jax.random.normal(k3, (1, HIDDEN), jnp.float32)
    beta = 0.1 * jax.random.normal(k4, (1, HIDDEN), jnp.float32)
    w2 = 0.05 * jax.random.normal(k5, (HIDDEN, C), jnp.float32)
    b2 = 0.02 * jax.random.normal(k6, (1, C), jnp.float32)

    out = two_layer_nn_forward(x, w1, b1, gamma, beta, w2, b2, tile_rows=128)
    out = jax.block_until_ready(out)

    ref = two_layer_nn_ref(x, w1, b1, gamma, beta, w2, b2)

    assert out.shape == (N_ROWS, C)
    max_err = float(jnp.max(jnp.abs(out - ref)))
    assert max_err < 2e-2, f"mismatch vs reference: {max_err}"

    print("KERNEL_OK")
</pallas_src>

<mosaic_0001>
module attributes {stable_mosaic.version = 11 : i64} {
  func.func @_stats_kernel(%arg0: i32, %arg1: memref<128x128xf32, #tpu.memory_space<vmem>>, %arg2: memref<128x256xbf16, #tpu.memory_space<vmem>>, %arg3: memref<1x256xf32, #tpu.memory_space<vmem>>, %arg4: memref<1x256xf32, #tpu.memory_space<vmem>>, %arg5: memref<1x256xf32, #tpu.memory_space<vmem>>, %arg6: memref<1x256xf32, #tpu.memory_space<vmem>>, %arg7: memref<1x256xf32, #tpu.memory_space<vmem>>, %arg8: memref<1x256xf32, #tpu.memory_space<vmem>>, %arg9: memref<1x256xf32, #tpu.memory_space<vmem>>) attributes {dimension_semantics = [#tpu.dimension_semantics<arbitrary>], iteration_bounds = array<i64: 2>, scalar_prefetch = 0 : i64, scratch_operands = 2 : i64, tpu.core_type = #tpu.core_type<tc>, window_params = [{transform_indices = @transform_0, window_bounds = array<i64: 128, 128>}, {pipeline_mode = #tpu.pipeline_mode<synchronous>, transform_indices = @transform_1, window_bounds = array<i64: 128, 256>}, {pipeline_mode = #tpu.pipeline_mode<synchronous>, transform_indices = @transform_2, window_bounds = array<i64: 1, 256>}, {pipeline_mode = #tpu.pipeline_mode<synchronous>, transform_indices = @transform_3, window_bounds = array<i64: 1, 256>}, {pipeline_mode = #tpu.pipeline_mode<synchronous>, transform_indices = @transform_4, window_bounds = array<i64: 1, 256>}, {pipeline_mode = #tpu.pipeline_mode<synchronous>, transform_indices = @transform_5, window_bounds = array<i64: 1, 256>}, {pipeline_mode = #tpu.pipeline_mode<synchronous>, transform_indices = @transform_6, window_bounds = array<i64: 1, 256>}]} {
    %c0_i32 = arith.constant 0 : i32
    %0 = arith.cmpi eq, %arg0, %c0_i32 : i32
    %1 = arith.extui %0 : i1 to i32
    %c0_i32_0 = arith.constant 0 : i32
    %2 = arith.cmpi ne, %1, %c0_i32_0 : i32
    scf.if %2 {
      %cst_17 = arith.constant 0.000000e+00 : f32
      %24 = vector.broadcast %cst_17 : f32 to vector<1x256xf32>
      %c0_18 = arith.constant 0 : index
      %c0_19 = arith.constant 0 : index
      %25 = vector.load %arg8[%c0_18, %c0_19] : memref<1x256xf32, #tpu.memory_space<vmem>>, vector<1x256xf32>
      tpu.vector_store %arg8[%c0_18, %c0_19], %24 {strides = array<i32>} : memref<1x256xf32, #tpu.memory_space<vmem>>, vector<1x256xf32>,
      %cst_20 = arith.constant 0.000000e+00 : f32
      %26 = vector.broadcast %cst_20 : f32 to vector<1x256xf32>
      %c0_21 = arith.constant 0 : index
      %c0_22 = arith.constant 0 : index
      %27 = vector.load %arg9[%c0_21, %c0_22] : memref<1x256xf32, #tpu.memory_space<vmem>>, vector<1x256xf32>
      tpu.vector_store %arg9[%c0_21, %c0_22], %26 {strides = array<i32>} : memref<1x256xf32, #tpu.memory_space<vmem>>, vector<1x256xf32>,
    } else {
    }
    %c0 = arith.constant 0 : index
    %c0_1 = arith.constant 0 : index
    %3 = vector.load %arg1[%c0, %c0_1] : memref<128x128xf32, #tpu.memory_space<vmem>>, vector<128x128xf32>
    %4 = arith.truncf %3 : vector<128x128xf32> to vector<128x128xbf16>
    %c0_2 = arith.constant 0 : index
    %c0_3 = arith.constant 0 : index
    %5 = vector.load %arg2[%c0_2, %c0_3] : memref<128x256xbf16, #tpu.memory_space<vmem>>, vector<128x256xbf16>
    %cst = arith.constant dense<0.000000e+00> : vector<128x256xf32>
    %6 = tpu.matmul %4, %5, %cst {dimension_numbers = #tpu.dot_dimension_numbers<[1], [0], [0], [1], [0, 0, 1, 1], [], []>} : vector<128x128xbf16>, vector<128x256xbf16>, vector<128x256xf32> -> vector<128x256xf32>
    %c0_4 = arith.constant 0 : index
    %c0_5 = arith.constant 0 : index
    %7 = vector.load %arg3[%c0_4, %c0_5] : memref<1x256xf32, #tpu.memory_space<vmem>>, vector<1x256xf32>
    %8 = vector.broadcast %7 : vector<1x256xf32> to vector<128x256xf32>
    %9 = arith.addf %6, %8 : vector<128x256xf32>
    %c0_6 = arith.constant 0 : index
    %c0_7 = arith.constant 0 : index
    %10 = vector.load %arg8[%c0_6, %c0_7] : memref<1x256xf32, #tpu.memory_space<vmem>>, vector<1x256xf32>
    %cst_8 = arith.constant dense<0.000000e+00> : vector<256xf32>
    %11 = vector.multi_reduction <add>, %9, %cst_8 [0] : vector<128x256xf32> to vector<256xf32>
    %12 = vector.shape_cast %11 : vector<256xf32> to vector<1x256xf32>
    %13 = arith.addf %10, %12 : vector<1x256xf32>
    %c0_9 = arith.constant 0 : index
    %c0_10 = arith.constant 0 : index
    %14 = vector.load %arg8[%c0_9, %c0_10] : memref<1x256xf32, #tpu.memory_space<vmem>>, vector<1x256xf32>
    tpu.vector_store %arg8[%c0_9, %c0_10], %13 {strides = array<i32>} : memref<1x256xf32, #tpu.memory_space<vmem>>, vector<1x256xf32>,
    %c0_11 = arith.constant 0 : index
    %c0_12 = arith.constant 0 : index
    %15 = vector.load %arg9[%c0_11, %c0_12] : memref<1x256xf32, #tpu.memory_space<vmem>>, vector<1x256xf32>
    %16 = arith.mulf %9, %9 : vector<128x256xf32>
    %cst_13 = arith.constant dense<0.000000e+00> : vector<256xf32>
    %17 = vector.multi_reduction <add>, %16, %cst_13 [0] : vector<128x256xf32> to vector<256xf32>
    %18 = vector.shape_cast %17 : vector<256xf32> to vector<1x256xf32>
    %19 = arith.addf %15, %18 : vector<1x256xf32>
    %c0_14 = arith.constant 0 : index
    %c0_15 = arith.constant 0 : index
    %20 = vector.load %arg9[%c0_14, %c0_15] : memref<1x256xf32, #tpu.memory_space<vmem>>, vector<1x256xf32>
    tpu.vector_store %arg9[%c0_14, %c0_15], %19 {strides = array<i32>} : memref<1x256xf32, #tpu.memory_space<vmem>>, vector<1x256xf32>,
    %c1_i32 = arith.constant 1 : i32
    %21 = arith.cmpi eq, %arg0, %c1_i32 : i32
    %22 = arith.extui %21 : i1 to i32
    %c0_i32_16 = arith.constant 0 : i32
    %23 = arith.cmpi ne, %22, %c0_i32_16 : i32
    scf.if %23 {
      %c0_17 = arith.constant 0 : index
      %c0_18 = arith.constant 0 : index
      %24 = vector.load %arg8[%c0_17, %c0_18] : memref<1x256xf32, #tpu.memory_space<vmem>>, vector<1x256xf32>
      %cst_19 = arith.constant 3.906250e-03 : f32
      %25 = vector.broadcast %cst_19 : f32 to vector<1x256xf32>
      %26 = arith.mulf %24, %25 : vector<1x256xf32>
      %c0_20 = arith.constant 0 : index
      %c0_21 = arith.constant 0 : index
      %27 = vector.load %arg9[%c0_20, %c0_21] : memref<1x256xf32, #tpu.memory_space<vmem>>, vector<1x256xf32>
      %cst_22 = arith.constant 3.906250e-03 : f32
      %28 = vector.broadcast %cst_22 : f32 to vector<1x256xf32>
      %29 = arith.mulf %27, %28 : vector<1x256xf32>
      %30 = arith.mulf %26, %26 : vector<1x256xf32>
      %31 = arith.subf %29, %30 : vector<1x256xf32>
      %cst_23 = arith.constant 9.99999974E-6 : f32
      %32 = vector.broadcast %cst_23 : f32 to vector<1x256xf32>
      %33 = arith.addf %31, %32 : vector<1x256xf32>
      %34 = math.rsqrt %33 : vector<1x256xf32>
      %c0_24 = arith.constant 0 : index
      %c0_25 = arith.constant 0 : index
      %35 = vector.load %arg4[%c0_24, %c0_25] : memref<1x256xf32, #tpu.memory_space<vmem>>, vector<1x256xf32>
      %36 = arith.mulf %35, %34 : vector<1x256xf32>
      %c0_26 = arith.constant 0 : index
      %c0_27 = arith.constant 0 : index
      %37 = vector.load %arg6[%c0_26, %c0_27] : memref<1x256xf32, #tpu.memory_space<vmem>>, vector<1x256xf32>
      tpu.vector_store %arg6[%c0_26, %c0_27], %36 {strides = array<i32>} : memref<1x256xf32, #tpu.memory_space<vmem>>, vector<1x256xf32>,
      %c0_28 = arith.constant 0 : index
      %c0_29 = arith.constant 0 : index
      %38 = vector.load %arg5[%c0_28, %c0_29] : memref<1x256xf32, #tpu.memory_space<vmem>>, vector<1x256xf32>
      %39 = arith.mulf %26, %36 : vector<1x256xf32>
      %40 = arith.subf %38, %39 : vector<1x256xf32>
      %c0_30 = arith.constant 0 : index
      %c0_31 = arith.constant 0 : index
      %41 = vector.load %arg7[%c0_30, %c0_31] : memref<1x256xf32, #tpu.memory_space<vmem>>, vector<1x256xf32>
      tpu.vector_store %arg7[%c0_30, %c0_31], %40 {strides = array<i32>} : memref<1x256xf32, #tpu.memory_space<vmem>>, vector<1x256xf32>,
    } else {
    }
    return
  }
  func.func @transform_0(%arg0: i32) -> (i32, i32) {
    %c0_i32 = arith.constant 0 : i32
    %c0_i32_0 = arith.constant 0 : i32
    return %arg0, %c0_i32 : i32, i32
  }
  func.func @transform_1(%arg0: i32) -> (i32, i32) {
    %c0_i32 = arith.constant 0 : i32
    %c0_i32_0 = arith.constant 0 : i32
    %c0_i32_1 = arith.constant 0 : i32
    return %c0_i32, %c0_i32_0 : i32, i32
  }
  func.func @transform_2(%arg0: i32) -> (i32, i32) {
    %c0_i32 = arith.constant 0 : i32
    %c0_i32_0 = arith.constant 0 : i32
    %c0_i32_1 = arith.constant 0 : i32
    return %c0_i32, %c0_i32_0 : i32, i32
  }
  func.func @transform_3(%arg0: i32) -> (i32, i32) {
    %c0_i32 = arith.constant 0 : i32
    %c0_i32_0 = arith.constant 0 : i32
    %c0_i32_1 = arith.constant 0 : i32
    return %c0_i32, %c0_i32_0 : i32, i32
  }
  func.func @transform_4(%arg0: i32) -> (i32, i32) {
    %c0_i32 = arith.constant 0 : i32
    %c0_i32_0 = arith.constant 0 : i32
    %c0_i32_1 = arith.constant 0 : i32
    return %c0_i32, %c0_i32_0 : i32, i32
  }
  func.func @transform_5(%arg0: i32) -> (i32, i32) {
    %c0_i32 = arith.constant 0 : i32
    %c0_i32_0 = arith.constant 0 : i32
    %c0_i32_1 = arith.constant 0 : i32
    return %c0_i32, %c0_i32_0 : i32, i32
  }
  func.func @transform_6(%arg0: i32) -> (i32, i32) {
    %c0_i32 = arith.constant 0 : i32
    %c0_i32_0 = arith.constant 0 : i32
    %c0_i32_1 = arith.constant 0 : i32
    return %c0_i32, %c0_i32_0 : i32, i32
  }
}

</mosaic_0001>

<bundles_post_ra>
// kernel: tpu_custom_call.1
= control target key start
LH: loop header
LB: loop body
LE: loop exit
PB: predicated region body
PF: predicated region fallthrough
CT: control target
= control target key end

     0   :  { %12 = vsyncpa [#allocation5], 0  ;;  %s1548_s0 = inlined_call_operand.hbm [shape: f32[256,128], index: 0, kind: input, shape index: {}]   ;;  %s1549_s1 = inlined_call_operand.hbm [shape: bf16[128,256], index: 1, kind: input, shape index: {}]   ;;  %s1550_s2 = inlined_call_operand.hbm [shape: f32[1,256], index: 2, kind: input, shape index: {}]   ;;  %s1551_s3 = inlined_call_operand.vmem [shape: f32[1,256], index: 3, kind: input, shape index: {}]   ;;  %s1552_s4 = inlined_call_operand.hbm [shape: f32[1,256], index: 4, kind: input, shape index: {}]   ;;  %s1553_s5 = inlined_call_operand.hbm [shape: f32[1,256], index: 5, kind: output, shape index: {0}]   ;;  %s1554_s6 = inlined_call_operand.hbm [shape: f32[1,256], index: 6, kind: output, shape index: {1}]  }
   0x1   :  { %14 = vsyncpa [#allocation5 + $0x1], 0 }
   0x2   :  { %15 = vsyncpa [#allocation8], 0 }
   0x3   :  { %16 = vsyncpa [#allocation11], 0 }
   0x4   :  { %17 = vsyncpa [#allocation6], 0 }
   0x5   :  { %18 = vsyncpa [#allocation14], 0  ;;  %s1296_s21 = smov 0   ;;  %s1298_s22 = smov 0  }
   0x6   :  { %s1300_s23 = smov 0   ;;  %s1302_s24 = smov 0  }
   0x7 LB: > { %s1315_s25 = sadd.s32 4294967295, %s1251_s24   ;;  %p44_p0 = scmp.ne.s32.totalorder %s1243_s22, %s1239_s21  ;;  %s1251_s24 = sphi %s1302_s24, %s1564_s24   ;;  %s1247_s23 = sphi %s1300_s23, %s1563_s23   ;;  %s1243_s22 = sphi %s1298_s22, %s1562_s22   ;;  %s1239_s21 = sphi %s1296_s21, %s1561_s21  }
   0x8   : > { %p45_p1 = scmp.eq.s32.totalorder %s1315_s25, 0  ;;  %p818_p2 = scmp.ge.s32.totalorder %s1251_s24, 1 }
   0x9   : > { %p181_p3 = scmp.lt.s32.totalorder %s1251_s24, 3  ;;  %p819_p4 = scmp.ne.s32.totalorder %s1315_s25, 0 }
   0xa   : > { %p1324_p5 = por %p45_p1, %p44_p0  ;;  %s192_s29 = sshll.u32 %s1549_s1, 4  ;;  %s193_s29 = int_to_ptr.hbm [resolvable:$true] %s192_s29 }
   0xb   : > { %p1331_p6 = pnand %p818_p2, %p181_p3  ;;  %s1253_s7 = smov [#allocation7]  }
   0xc   : > { %s194_s8 = sshll.u32 %s1253_s7, 4  ;;  %s207_s12 = sshll.u32 %s1550_s2, 4  ;;  %s195_s8 = int_to_ptr.vmem [resolvable:$true] %s194_s8  ;;  %s208_s12 = int_to_ptr.hbm [resolvable:$true] %s207_s12 }
   0xd   : > { %p958_p7 = pneg %p1331_p6  ;;  %s1254_s13 = smov 128  }
   0xe   : > { %s1255_s14 = smov 8   ;;  %s1256_s15 = smov [#allocation9]  }
   0xf   : > { %p1339_p8 = pnand %p958_p7, %p45_p1  ;;  %s209_s16 = sshll.u32 %s1256_s15, 4  ;;  %s210_s16 = int_to_ptr.vmem [resolvable:$true] %s209_s16 }
  0x10   : > { %s222_s19 = sshll.u32 %s1552_s4, 4  ;;  %s1257_s20 = smov [#allocation10]   ;;  %s223_s19 = int_to_ptr.hbm [resolvable:$true] %s222_s19 }
  0x11   : > { %961 = dma.hbm_to_vmem [thread:$0]  (!%p1339_p8), %s193_s29, 2048, %s195_s8, [#allocation8], %s1254_s13, %s1254_s13, %s1255_s14  }
  0x12   : > { %964 = dma.hbm_to_vmem [thread:$0]  (!%p1339_p8), %s208_s12, 32, %s210_s16, [#allocation8]  }
  0x13   : > { %s224_s21 = sshll.u32 %s1257_s20, 4  ;;  %s1357_s27 = sadd.s32 1, %s1251_s24   ;;  %s225_s21 = int_to_ptr.vmem [resolvable:$true] %s224_s21 }
  0x14   : > { %967 = dma.hbm_to_vmem [thread:$0]  (!%p1339_p8), %s223_s19, 32, %s225_s21, [#allocation11]  }
  0x15   : > { %s28_s28 = ssub.s32 %s1251_s24, %s1357_s27  ;;  %s31_s29 = sadd.s32 1, %s1247_s23 }
  0x16   : > { %p29_p9 = scmp.eq.s32.totalorder %s28_s28, 0  ;;  %p38_p10 = scmp.ne.s32.totalorder %s1247_s23, %s1243_s22 }
  0x17   : > { %p39_p11 = scmp.eq.s32.totalorder %s1251_s24, 0  ;;  %p975_p12 = scmp.lt.s32.totalorder %s1251_s24, 2 }
  0x18   : > { %s1369_s7 = scalar_select %p29_p9, %s1247_s23, %s31_s29  }
  0x19   : > { %p40_p13 = por %p39_p11, %p38_p10  ;;  %s235_s8 = sand.u32 1, %s1247_s23  }
  0x1a   : > { %s823_s10 = sshll.u32 %s235_s8, 7  ;;  %s903_s11 = sshll.u32 %s1251_s24, 7 }
  0x1b   : > { %s244_s16 = scalar_lea.hbm %s1548_s0, %s903_s11  ;;  %s239_s17 = scalar_lea.vmem [#allocation4], %s823_s10 }
  0x1c   : > { %s247_s9 = sshll.u32 %s239_s17, 4  ;;  %s245_s18 = sshll.u32 %s244_s16, 4  ;;  %s248_s9 = int_to_ptr.vmem [resolvable:$true] %s247_s9  ;;  %s246_s18 = int_to_ptr.hbm [resolvable:$true] %s245_s18 }
  0x1d   : > { %p1376_p0 = pnand %p975_p12, %p40_p13  ;;  %s236_s20 = scalar_lea.sflag [#allocation5], %s235_s8 }
  0x1e   : > { %s1115_s21 = sshra.s32 %s246_s18, 4  ;;  %s1122_s10 = scalar_lea.hbm %s1548_s0, 256  ;;  %s1116_s21 = int_to_ptr.hbm [resolvable:$true] %s1115_s21 }
  0x1f   : > { %s1117_s28 = scalar_lea.hbm %s1116_s21, 128  ;;  %p1119_p3 = pneg %p1376_p0 }
  0x20   : > { %p1118_p2 = scmp.ne.s32.totalorder %s1116_s21, %s1117_s28  ;;  %p1123_p9 = scmp.lt.s32.totalorder %s1116_s21, %s1548_s0 }
  0x21   : > { %p1124_p10 = scmp.lt.s32.totalorder %s1122_s10, %s1117_s28 }
  0x22   : > { %p1120_p7 = pnand %p1119_p3, %p1118_p2 }
  0x23   : > { %p1125_p11 = por %p1124_p10, %p1123_p9 }
  0x24   : > { %p1121_p8 = pneg %p1120_p7 }
  0x26   : > { %p1126_p12 = pnand %p1125_p11, %p1121_p8 }
  0x28   : > { %1129 = shalt.err (!%p1126_p12)
}
  0x29   : > { %971 = dma.hbm_to_vmem [thread:$0]  (!%p1376_p0), %s246_s18, 2048, %s248_s9, %s236_s20, %s1254_s13, %s1254_s13, %s1255_s14  }
  0x2a   : > { %259 = sbr.rel (%p1331_p6) target bundleno = 367 (0x16f), region = 40  ;;  %s261_s8 = sand.u32 (!%p1331_p6), 1, %s1243_s22  }
  0x2b   : > { %s827_s15 = sshll.u32 (!%p1331_p6), %s261_s8, 7  ;;  %s262_s16 = scalar_lea.sflag (!%p1331_p6), [#allocation5], %s261_s8 }
  0x2c   : > { %s1396_s17 = scalar_lea.vmem (!%p1331_p6), [#allocation4], %s827_s15 }
  0x2f   : > { %1218 = dma.done.wait (%p1324_p5), %s262_s16, 2048  }
  0x30   : > { %1220 = vsyncadd (%p1324_p5), %s262_s16, 4294965248 }
  0x31   : > { %1222 = dma.done.wait (%p45_p1), [#allocation8], 2080  }
  0x32   : > { %1224 = vsyncadd (%p45_p1), [#allocation8], 4294965216 }
  0x33   : > { %1226 = dma.done.wait (%p45_p1), [#allocation11], 32  }
  0x34   : > { %1228 = vsyncadd (%p45_p1), [#allocation11], 4294967264  ;;  %309 = sbr.rel (%p819_p4) target bundleno = 62 (0x3e), region = 60 }
  0x39   : > { %v310_v0 = vlaneseq  ;;  %v1258_v1 = vmov 0.0  }
  0x3b   : > { %vm312_vm0 = vcmp.lt.s32.totalorder %v310_v0, 256 }
  0x3c   : > { %314 = vst.msk [vmem:[#allocation2] sm:$0x3] %vm312_vm0, %v1258_v1 }
  0x3d   : > { %315 = vst.msk [vmem:[#allocation3] sm:$0x3] %vm312_vm0, %v1258_v1 }
  0x3e PF: > { %v890_v2 = vld [vmem:[#allocation7 + $0x70] sm:$0xf]  ;;  %v919_v3 = vld [vmem:[#allocation7 + $0x74] sm:$0xf0]  ;;  %v918_v4 = vld [vmem:[#allocation7 + $0x74] sm:$0xf] }
  0x3f   : > { %v891_v5 = vor.u32 %v919_v3, %v890_v2  ;;  %v892_v6 = vld [vmem:[#allocation7 + $0x78] sm:$0xf0]  ;;  %v882_v7 = vld [vmem:[#allocation7 + $0x60] sm:$0xf]  ;;  %v917_v8 = vld [vmem:[#allocation7 + $0x64] sm:$0xf0] }
  0x40   : > { %v895_v9 = vor.u32 %v918_v4, %v892_v6  ;;  %v916_v10 = vld [vmem:[#allocation7 + $0x64] sm:$0xf]  ;;  %v884_v11 = vld [vmem:[#allocation7 + $0x68] sm:$0xf0]  ;;  %v883_v12 = vor.u32 %v917_v8, %v882_v7  ;;  %v874_v14 = vld [vmem:[#allocation7 + $0x50] sm:$0xf] }
  0x41   : > { %442 = vmatpush.bf16.msra.mxu0 %v891_v5  ;;  %920 = vmatpush.bf16.msra.mxu2 %v891_v5  ;;  %v887_v13 = vor.u32 %v916_v10, %v884_v11  ;;  %v915_v15 = vld [vmem:[#allocation7 + $0x54] sm:$0xf0]  ;;  %v914_v16 = vld [vmem:[#allocation7 + $0x54] sm:$0xf]  ;;  %v876_v17 = vld [vmem:[#allocation7 + $0x58] sm:$0xf0] }
  0x42   : > { %491 = vmatpush.bf16.msra.mxu1 %v895_v9  ;;  %928 = vmatpush.bf16.msra.mxu3 %v895_v9  ;;  %v875_v18 = vor.u32 %v915_v15, %v874_v14  ;;  %v879_v19 = vor.u32 %v914_v16, %v876_v17  ;;  %v866_v20 = vld [vmem:[#allocation7 + $0x40] sm:$0xf]  ;;  %v913_v21 = vld [vmem:[#allocation7 + $0x44] sm:$0xf0]  ;;  %v912_v22 = vld [vmem:[#allocation7 + $0x44] sm:$0xf] }
  0x43   : > { %v868_v23 = vld [vmem:[#allocation7 + $0x48] sm:$0xf0]  ;;  %v867_v24 = vor.u32 %v913_v21, %v866_v20  ;;  %v858_v26 = vld [vmem:[#allocation7 + $0x30] sm:$0xf]  ;;  %v911_v27 = vld [vmem:[#allocation7 + $0x34] sm:$0xf0] }
  0x44   : > { %v871_v25 = vor.u32 %v912_v22, %v868_v23  ;;  %v910_v28 = vld [vmem:[#allocation7 + $0x34] sm:$0xf]  ;;  %v860_v29 = vld [vmem:[#allocation7 + $0x38] sm:$0xf0]  ;;  %v859_v30 = vor.u32 %v911_v27, %v858_v26  ;;  %v850_v32 = vld [vmem:[#allocation7 + $0x20] sm:$0xf] }
  0x45   : > { %443 = vmatpush.bf16.msra.mxu0 %v883_v12  ;;  %921 = vmatpush.bf16.msra.mxu2 %v883_v12  ;;  %v863_v31 = vor.u32 %v910_v28, %v860_v29  ;;  %v909_v33 = vld [vmem:[#allocation7 + $0x24] sm:$0xf0]  ;;  %v908_v34 = vld [vmem:[#allocation7 + $0x24] sm:$0xf]  ;;  %v852_v35 = vld [vmem:[#allocation7 + $0x28] sm:$0xf0] }
  0x46   : > { %492 = vmatpush.bf16.msra.mxu1 %v887_v13  ;;  %929 = vmatpush.bf16.msra.mxu3 %v887_v13  ;;  %v851_v36 = vor.u32 %v909_v33, %v850_v32  ;;  %v855_v37 = vor.u32 %v908_v34, %v852_v35  ;;  %v842_v38 = vld [vmem:[#allocation7 + $0x10] sm:$0xf]  ;;  %v907_v39 = vld [vmem:[#allocation7 + $0x14] sm:$0xf0]  ;;  %v906_v40 = vld [vmem:[#allocation7 + $0x14] sm:$0xf] }
  0x47   : > { %v844_v41 = vld [vmem:[#allocation7 + $0x18] sm:$0xf0]  ;;  %v843_v42 = vor.u32 %v907_v39, %v842_v38  ;;  %v834_v44 = vld [vmem:[#allocation7] sm:$0xf]  ;;  %v905_v45 = vld [vmem:[#allocation7 + $0x4] sm:$0xf0] }
  0x48   : > { %v847_v43 = vor.u32 %v906_v40, %v844_v41  ;;  %v904_v46 = vld [vmem:[#allocation7 + $0x4] sm:$0xf]  ;;  %v836_v47 = vld [vmem:[#allocation7 + $0x8] sm:$0xf0]  ;;  %v835_v48 = vor.u32 %v905_v45, %v834_v44  ;;  %v318_v56 = vld [vmem:[%s1396_s17 + $0x10] sm:$0xff]  ;;  %vm586_vm1 = vcmask 1040384  }
  0x49   : > { %444 = vmatpush.bf16.msra.mxu0 %v875_v18  ;;  %922 = vmatpush.bf16.msra.mxu2 %v875_v18  ;;  %v316_v49 = vld [vmem:[%s1396_s17] sm:$0xff]  ;;  %v317_v50 = vld [vmem:[%s1396_s17 + $0x8] sm:$0xff]  ;;  %v839_v51 = vor.u32 %v904_v46, %v836_v47  ;;  %v319_v57 = vld [vmem:[%s1396_s17 + $0x18] sm:$0xff]  ;;  %p896_p1 = scmp.ne.s32.totalorder %s1315_s25, 1 }
  0x4a   : > { %493 = vmatpush.bf16.msra.mxu1 %v879_v19  ;;  %930 = vmatpush.bf16.msra.mxu3 %v879_v19  ;;  %v324_v52 = vld [vmem:[%s1396_s17 + $0x40] sm:$0xff]  ;;  %v325_v53 = vld [vmem:[%s1396_s17 + $0x48] sm:$0xff]  ;;  %v332_v54 = vpack.c.bf16 %v317_v50, %v316_v49  ;;  %v326_v58 = vld [vmem:[%s1396_s17 + $0x50] sm:$0xff]  ;;  %v333_v60 = vpack.c.bf16 %v319_v57, %v318_v56 }
  0x4b   : > { %v336_v55 = vpack.c.bf16 %v325_v53, %v324_v52  ;;  %v327_v59 = vld [vmem:[%s1396_s17 + $0x58] sm:$0xff]  ;;  %v320_v62 = vld [vmem:[%s1396_s17 + $0x20] sm:$0xff]  ;;  %v321_v63 = vld [vmem:[%s1396_s17 + $0x28] sm:$0xff] }
  0x4c   : > { %v337_v61 = vpack.c.bf16 %v327_v59, %v326_v58  ;;  %v328_v0 = vld [vmem:[%s1396_s17 + $0x60] sm:$0xff]  ;;  %v329_v1 = vld [vmem:[%s1396_s17 + $0x68] sm:$0xff]  ;;  %v334_v2 = vpack.c.bf16 %v321_v63, %v320_v62  ;;  %v322_v4 = vld [vmem:[%s1396_s17 + $0x30] sm:$0xff] }
  0x4d   : > { %445 = vmatpush.bf16.msra.mxu0 %v867_v24  ;;  %923 = vmatpush.bf16.msra.mxu2 %v867_v24  ;;  %v338_v3 = vpack.c.bf16 %v329_v1, %v328_v0  ;;  %v323_v5 = vld [vmem:[%s1396_s17 + $0x38] sm:$0xff]  ;;  %v330_v6 = vld [vmem:[%s1396_s17 + $0x70] sm:$0xff]  ;;  %v356_v28 = vld [vmem:[#allocation9] sm:$0x3] }
  0x4e   : > { %494 = vmatpush.bf16.msra.mxu1 %v871_v25  ;;  %931 = vmatpush.bf16.msra.mxu3 %v871_v25  ;;  %v331_v7 = vld [vmem:[%s1396_s17 + $0x78] sm:$0xff]  ;;  %v335_v8 = vpack.c.bf16 %v323_v5, %v322_v4  ;;  %v1450_v32 = vperm.slane %v356_v28, 1 }
  0x4f   : > { %v339_v9 = vpack.c.bf16 %v331_v7, %v330_v6 }
  0x51   : > { %446 = vmatpush.bf16.msra.mxu0 %v859_v30  ;;  %924 = vmatpush.bf16.msra.mxu2 %v859_v30  ;;  %v1446_v30 = vperm.slane %v356_v28, 0 }
  0x52   : > { %495 = vmatpush.bf16.msra.mxu1 %v863_v31  ;;  %932 = vmatpush.bf16.msra.mxu3 %v863_v31 }
  0x55   : > { %447 = vmatpush.bf16.msra.mxu0 %v851_v36  ;;  %925 = vmatpush.bf16.msra.mxu2 %v851_v36 }
  0x56   : > { %496 = vmatpush.bf16.msra.mxu1 %v855_v37  ;;  %933 = vmatpush.bf16.msra.mxu3 %v855_v37 }
  0x59   : > { %448 = vmatpush.bf16.msra.mxu0 %v843_v42  ;;  %926 = vmatpush.bf16.msra.mxu2 %v843_v42 }
  0x5a   : > { %497 = vmatpush.bf16.msra.mxu1 %v847_v43  ;;  %934 = vmatpush.bf16.msra.mxu3 %v847_v43 }
  0x5d   : > { %449 = vmatpush.bf16.msra.mxu0 %v835_v48  ;;  %927 = vmatpush.bf16.msra.mxu2 %v835_v48 }
  0x5e   : > { %498 = vmatpush.bf16.msra.mxu1 %v839_v51  ;;  %935 = vmatpush.bf16.msra.mxu3 %v839_v51 }
  0x60   : > { %450 = vmatmul.bf16.vlgmr.msra.gmra.mxu0 %v332_v54  ;;  %470 = vmatmul.bf16.vlgmr.msra.gmra.mxu2 %v336_v55 }
  0x61   : > { %499 = vmatmul.bf16.vlgmr.msra.gmra.mxu1 %v332_v54  ;;  %519 = vmatmul.bf16.vlgmr.msra.gmra.mxu3 %v336_v55 }
  0x70   : > { %455 = vmatmul.bf16.gmra.mxu0 %v333_v60  ;;  %475 = vmatmul.bf16.gmra.mxu2 %v337_v61 }
  0x71   : > { %504 = vmatmul.bf16.gmra.mxu1 %v333_v60  ;;  %524 = vmatmul.bf16.gmra.mxu3 %v337_v61 }
  0x80   : > { %460 = vmatmul.bf16.gmra.mxu0 %v334_v2  ;;  %480 = vmatmul.bf16.gmra.mxu2 %v338_v3 }
  0x81   : > { %509 = vmatmul.bf16.gmra.mxu1 %v334_v2  ;;  %529 = vmatmul.bf16.gmra.mxu3 %v338_v3 }
  0x90   : > { %465 = vmatmul.bf16.gmra.mxu0 %v335_v8  ;;  %485 = vmatmul.bf16.gmra.mxu2 %v339_v9 }
  0x91   : > { %514 = vmatmul.bf16.gmra.mxu1 %v335_v8  ;;  %534 = vmatmul.bf16.gmra.mxu3 %v339_v9 }
  0xdd   : > { %v451_v10 = vpop.f32.mrf.mxu0 }
  0xde   : > { %v500_v11 = vpop.f32.mrf.mxu1  ;;  %v452_v37 = vadd.f32 %v451_v10, %v1446_v30 }
  0xdf   : > { %v501_v39 = vadd.f32 %v500_v11, %v1450_v32 }
  0xe0   : > { %v596_v45 = vmul.f32 %v452_v37, %v452_v37 }
  0xe1   : > { %v597_v49 = vmul.f32 %v501_v39, %v501_v39 }
  0xe3   : > { %v1428_v12 = vpop.f32.mrf.mxu2 }
  0xe4   : > { %v1430_v13 = vpop.f32.mrf.mxu3 }
  0xe5   : > { %v453_v14 = vpop.f32.mrf.mxu0 }
  0xe6   : > { %v502_v15 = vpop.f32.mrf.mxu1  ;;  %v454_v34 = vadd.f32 %v453_v14, %v1446_v30 }
  0xe7   : > { %v503_v36 = vadd.f32 %v502_v15, %v1450_v32 }
  0xe8   : > { %v598_v41 = vmul.f32 %v454_v34, %v454_v34  ;;  %v541_v46 = vadd.f32 %v454_v34, %v452_v37  ;;  %v472_v34 = vadd.f32 %v1428_v12, %v1446_v30 }
  0xe9   : > { %v599_v43 = vmul.f32 %v503_v36, %v503_v36  ;;  %v562_v50 = vadd.f32 %v503_v36, %v501_v39  ;;  %v521_v39 = vadd.f32 %v1430_v13, %v1450_v32 }
  0xea   : > { %v628_v55 = vadd.f32 %v598_v41, %v596_v45 }
  0xeb   : > { %v1432_v16 = vpop.f32.mrf.mxu2  ;;  %v649_v61 = vadd.f32 %v599_v43, %v597_v49 }
  0xec   : > { %v1434_v17 = vpop.f32.mrf.mxu3 }
  0xed   : > { %v456_v18 = vpop.f32.mrf.mxu0 }
  0xee   : > { %v505_v19 = vpop.f32.mrf.mxu1  ;;  %v457_v38 = vadd.f32 %v456_v18, %v1446_v30 }
  0xef   : > { %v506_v40 = vadd.f32 %v505_v19, %v1450_v32 }
  0xf0   : > { %v600_v47 = vmul.f32 %v457_v38, %v457_v38  ;;  %v542_v56 = vadd.f32 %v541_v46, %v457_v38 }
  0xf1   : > { %v601_v51 = vmul.f32 %v506_v40, %v506_v40  ;;  %v563_v62 = vadd.f32 %v562_v50, %v506_v40 }
  0xf2   : > { %v629_v1 = vadd.f32 %v628_v55, %v600_v47 }
  0xf3   : > { %v1436_v20 = vpop.f32.mrf.mxu2  ;;  %v650_v5 = vadd.f32 %v649_v61, %v601_v51 }
  0xf4   : > { %v1438_v21 = vpop.f32.mrf.mxu3  ;;  %v477_v13 = vadd.f32 %v1436_v20, %v1446_v30 }
  0xf5   : > { %v458_v22 = vpop.f32.mrf.mxu0 }
  0xf6   : > { %v507_v23 = vpop.f32.mrf.mxu1  ;;  %v459_v42 = vadd.f32 %v458_v22, %v1446_v30 }
  0xf7   : > { %v508_v44 = vadd.f32 %v507_v23, %v1450_v32 }
  0xf8   : > { %v602_v57 = vmul.f32 %v459_v42, %v459_v42  ;;  %v543_v2 = vadd.f32 %v542_v56, %v459_v42  ;;  %v613_v56 = vmul.f32 %v521_v39, %v521_v39 }
  0xf9   : > { %v603_v63 = vmul.f32 %v508_v44, %v508_v44  ;;  %v564_v6 = vadd.f32 %v563_v62, %v508_v44  ;;  %v474_v44 = vadd.f32 %v1432_v16, %v1446_v30  ;;  %v526_v16 = vadd.f32 %v1438_v21, %v1450_v32 }
  0xfa   : > { %v630_v9 = vadd.f32 %v629_v1, %v602_v57 }
  0xfb   : > { %v1440_v24 = vpop.f32.mrf.mxu2  ;;  %v651_v14 = vadd.f32 %v650_v5, %v603_v63  ;;  %v617_v5 = vmul.f32 %v526_v16, %v526_v16 }
  0xfc   : > { %v1442_v25 = vpop.f32.mrf.mxu3  ;;  %v479_v61 = vadd.f32 %v1440_v24, %v1446_v30 }
  0xfd   : > { %v461_v26 = vpop.f32.mrf.mxu0 }
  0xfe   : > { %v510_v27 = vpop.f32.mrf.mxu1  ;;  %v462_v48 = vadd.f32 %v461_v26, %v1446_v30 }
  0xff   : > { %v511_v52 = vadd.f32 %v510_v27, %v1450_v32 }
 0x100   : > { %v604_v3 = vmul.f32 %v462_v48, %v462_v48  ;;  %v544_v10 = vadd.f32 %v543_v2, %v462_v48  ;;  %v523_v48 = vadd.f32 %v1434_v17, %v1450_v32  ;;  %v616_v2 = vmul.f32 %v477_v13, %v477_v13 }
 0x101   : > { %v605_v7 = vmul.f32 %v511_v52, %v511_v52  ;;  %v565_v15 = vadd.f32 %v564_v6, %v511_v52  ;;  %v612_v52 = vmul.f32 %v472_v34, %v472_v34 }
 0x102   : > { %v631_v19 = vadd.f32 %v630_v9, %v604_v3  ;;  %v615_v63 = vmul.f32 %v523_v48, %v523_v48 }
 0x103   : > { %v1444_v29 = vpop.f32.mrf.mxu2  ;;  %v652_v26 = vadd.f32 %v651_v14, %v605_v7 }
 0x104   : > { %v1448_v31 = vpop.f32.mrf.mxu3  ;;  %v482_v3 = vadd.f32 %v1444_v29, %v1446_v30 }
 0x105   : > { %v463_v33 = vpop.f32.mrf.mxu0  ;;  %v531_v6 = vadd.f32 %v1448_v31, %v1450_v32 }
 0x106   : > { %v512_v35 = vpop.f32.mrf.mxu1  ;;  %v464_v58 = vadd.f32 %v463_v33, %v1446_v30 }
 0x107   : > { %v513_v0 = vadd.f32 %v512_v35, %v1450_v32 }
 0x108   : > { %v606_v11 = vmul.f32 %v464_v58, %v464_v58  ;;  %v545_v22 = vadd.f32 %v544_v10, %v464_v58 }
 0x109   : > { %v607_v18 = vmul.f32 %v513_v0, %v513_v0  ;;  %v566_v27 = vadd.f32 %v565_v15, %v513_v0  ;;  %v528_v0 = vadd.f32 %v1442_v25, %v1450_v32 }
 0x10a   : > { %v632_v35 = vadd.f32 %v631_v19, %v606_v11  ;;  %v620_v19 = vmul.f32 %v482_v3, %v482_v3 }
 0x10b   : > { %v1462_v54 = vpop.f32.mrf.mxu2  ;;  %v653_v40 = vadd.f32 %v652_v26, %v607_v18  ;;  %v619_v11 = vmul.f32 %v528_v0, %v528_v0 }
 0x10c   : > { %v1465_v60 = vpop.f32.mrf.mxu3  ;;  %v484_v9 = vadd.f32 %v1462_v54, %v1446_v30 }
 0x10d   : > { %v466_v53 = vpop.f32.mrf.mxu0  ;;  %v533_v14 = vadd.f32 %v1465_v60, %v1450_v32 }
 0x10e   : > { %v515_v59 = vpop.f32.mrf.mxu1  ;;  %v467_v4 = vadd.f32 %v466_v53, %v1446_v30 }
 0x10f   : > { %v516_v8 = vadd.f32 %v515_v59, %v1450_v32  ;;  %v614_v59 = vmul.f32 %v474_v44, %v474_v44  ;;  %v623_v60 = vmul.f32 %v533_v14, %v533_v14 }
 0x110   : > { %v608_v23 = vmul.f32 %v467_v4, %v467_v4  ;;  %v546_v36 = vadd.f32 %v545_v22, %v467_v4 }
 0x111   : > { %v609_v28 = vmul.f32 %v516_v8, %v516_v8  ;;  %v567_v41 = vadd.f32 %v566_v27, %v516_v8  ;;  %v618_v8 = vmul.f32 %v479_v61, %v479_v61  ;;  %v621_v27 = vmul.f32 %v531_v6, %v531_v6 }
 0x112   : > { %v633_v45 = vadd.f32 %v632_v35, %v608_v23 }
 0x113   : > { %v486_v43 = vpop.f32.mrf.mxu2  ;;  %v654_v49 = vadd.f32 %v653_v40, %v609_v28 }
 0x114   : > { %v535_v12 = vpop.f32.mrf.mxu3  ;;  %v487_v22 = vadd.f32 %v486_v43, %v1446_v30 }
 0x115   : > { %v468_v33 = vpop.f32.mrf.mxu0  ;;  %v536_v28 = vadd.f32 %v535_v12, %v1450_v32 }
 0x116   : > { %v469_v37 = vadd.f32 %v468_v33, %v1446_v30  ;;  %v517_v38 = vpop.f32.mrf.mxu1 }
 0x117   : > { %v518_v42 = vadd.f32 %v517_v38, %v1450_v32 }
 0x118   : > { %v547_v46 = vadd.f32 %v546_v36, %v469_v37  ;;  %v610_v47 = vmul.f32 %v469_v37, %v469_v37 }
 0x119   : > { %v568_v50 = vadd.f32 %v567_v41, %v518_v42  ;;  %v611_v51 = vmul.f32 %v518_v42, %v518_v42  ;;  %v624_v42 = vmul.f32 %v487_v22, %v487_v22 }
 0x11a   : > { %v548_v53 = vadd.f32 %v547_v46, %v472_v34  ;;  %v634_v55 = vadd.f32 %v633_v45, %v610_v47  ;;  %v622_v34 = vmul.f32 %v484_v9, %v484_v9  ;;  %v625_v45 = vmul.f32 %v536_v28, %v536_v28 }
 0x11b   : > { %v569_v57 = vadd.f32 %v568_v50, %v521_v39  ;;  %v655_v58 = vadd.f32 %v654_v49, %v611_v51  ;;  %v488_v18 = vpop.f32.mrf.mxu2 }
 0x11c   : > { %v549_v17 = vadd.f32 %v548_v53, %v474_v44  ;;  %v635_v62 = vadd.f32 %v634_v55, %v612_v52  ;;  %v537_v26 = vpop.f32.mrf.mxu3  ;;  %v489_v37 = vadd.f32 %v488_v18, %v1446_v30 }
 0x11d   : > { %v570_v1 = vadd.f32 %v569_v57, %v523_v48  ;;  %v656_v20 = vadd.f32 %v655_v58, %v613_v56  ;;  %v538_v40 = vadd.f32 %v537_v26, %v1450_v32 }
 0x11e   : > { %v550_v4 = vadd.f32 %v549_v17, %v477_v13  ;;  %v636_v21 = vadd.f32 %v635_v62, %v614_v59  ;;  %v626_v48 = vmul.f32 %v489_v37, %v489_v37 }
 0x11f   : > { %v571_v7 = vadd.f32 %v570_v1, %v526_v16  ;;  %v657_v24 = vadd.f32 %v656_v20, %v615_v63  ;;  %v627_v51 = vmul.f32 %v538_v40, %v538_v40 }
 0x120   : > { %v637_v10 = vadd.f32 %v636_v21, %v616_v2  ;;  %v551_v25 = vadd.f32 %v550_v4, %v479_v61 }
 0x121   : > { %v658_v15 = vadd.f32 %v657_v24, %v617_v5  ;;  %v572_v29 = vadd.f32 %v571_v7, %v528_v0  ;;  %v590_v5 = vlaneseq }
 0x122   : > { %v552_v23 = vadd.f32 %v551_v25, %v482_v3  ;;  %v638_v31 = vadd.f32 %v637_v10, %v618_v8  ;;  %v540_v8 = vld [vmem:[#allocation2] sm:$0x3] }
 0x123   : > { %v573_v33 = vadd.f32 %v572_v29, %v531_v6  ;;  %v659_v54 = vadd.f32 %v658_v15, %v619_v11  ;;  %vm1500_vm2 = vcmp.lt.s32.totalorder %v590_v5, 256 }
 0x124   : > { %v553_v35 = vadd.f32 %v552_v23, %v484_v9  ;;  %v639_v36 = vadd.f32 %v638_v31, %v620_v19 }
 0x125   : > { %v574_v38 = vadd.f32 %v573_v33, %v533_v14  ;;  %v660_v39 = vadd.f32 %v659_v54, %v621_v27  ;;  %v595_v14 = vld [vmem:[#allocation3] sm:$0x3] }
 0x126   : > { %v554_v41 = vadd.f32 %v553_v35, %v487_v22  ;;  %v640_v43 = vadd.f32 %v639_v36, %v622_v34 }
 0x127   : > { %v575_v44 = vadd.f32 %v574_v38, %v536_v28  ;;  %v661_v46 = vadd.f32 %v660_v39, %v623_v60 }
 0x128   : > { %v641_v47 = vadd.f32 %v640_v43, %v624_v42  ;;  %v555_v12 = vadd.f32 %v554_v41, %v489_v37 }
 0x129   : > { %v662_v49 = vadd.f32 %v661_v46, %v625_v45  ;;  %v576_v50 = vadd.f32 %v575_v44, %v538_v40 }
 0x12a   : > { %v556_v52 = vrot.slane %v555_v12, 4  ;;  %v642_v13 = vadd.f32 %v641_v47, %v626_v48 }
 0x12b   : > { %v577_v30 = vrot.slane %v576_v50, 4  ;;  %v663_v53 = vadd.f32 %v662_v49, %v627_v51 }
 0x12c   : > { %v557_v55 = vadd.f32 %v556_v52, %v555_v12  ;;  %v643_v56 = vrot.slane %v642_v13, 4 }
 0x12d   : > { %v578_v16 = vadd.f32 %v577_v30, %v576_v50  ;;  %v664_v32 = vrot.slane %v663_v53, 4 }
 0x12e   : > { %v558_v57 = vrot.slane %v557_v55, 2  ;;  %v644_v58 = vadd.f32 %v643_v56, %v642_v13 }
 0x12f   : > { %v579_v59 = vrot.slane %v578_v16, 2  ;;  %v665_v61 = vadd.f32 %v664_v32, %v663_v53 }
 0x130   : > { %v559_v17 = vadd.f32 %v558_v57, %v557_v55  ;;  %v645_v62 = vrot.slane %v644_v58, 2 }
 0x131   : > { %v580_v63 = vadd.f32 %v579_v59, %v578_v16  ;;  %v666_v0 = vrot.slane %v665_v61, 2 }
 0x132   : > { %v646_v1 = vadd.f32 %v645_v62, %v644_v58  ;;  %v560_v3 = vrot.slane %v559_v17, 1 }
 0x133   : > { %v581_v20 = vrot.slane %v580_v63, 1  ;;  %v667_v2 = vadd.f32 %v666_v0, %v665_v61 }
 0x134   : > { %v647_v6 = vrot.slane %v646_v1, 1  ;;  %v561_v9 = vadd.f32 %v560_v3, %v559_v17 }
 0x135   : > { %v582_v4 = vadd.f32 %v581_v20, %v580_v63  ;;  %v668_v21 = vrot.slane %v667_v2, 1 }
 0x136   : > { %v648_v15 = vadd.f32 %v647_v6, %v646_v1 }
 0x137   : > { %v585_v7 = vrot.slane %v582_v4, 7  ;;  %v669_v24 = vadd.f32 %v668_v21, %v667_v2 }
 0x139   : > { %v672_v10 = vrot.slane %v669_v24, 7  ;;  %v587_v25 = vsel %vm586_vm1, %v561_v9, %v585_v7 }
 0x13a   : > { %v589_v29 = vadd.f32 %v587_v25, %v540_v8  ;;  %680 = sbr.rel (%p896_p1) target bundleno = 357 (0x165), region = 64 }
 0x13b   : > { %v673_v18 = vsel %vm586_vm1, %v648_v15, %v672_v10 }
 0x13c   : > { %594 = vst.msk [vmem:[#allocation2] sm:$0x3] %vm1500_vm2, %v589_v29  ;;  %v675_v19 = vadd.f32 %v673_v18, %v595_v14 }
 0x13e   : > { %676 = vst.msk [vmem:[#allocation3] sm:$0x3] %vm1500_vm2, %v675_v19 }
 0x13f   : > { %v698_v38 = vld [vmem:[%s1551_s3] sm:$0x3]  ;;  %v701_v41 = vld [vmem:[#allocation10] sm:$0x3] }
 0x143   : > { %v681_v22 = vld [vmem:[#allocation2] sm:$0x3] }
 0x144   : > { %v682_v31 = vmul.f32 0.00390625, %v681_v22 }
 0x145   : > { %v683_v23 = vld [vmem:[#allocation3] sm:$0x3] }
 0x146   : > { %v684_v26 = vmul.f32 0.00390625, %v683_v23  ;;  %v685_v27 = vmul.f32 %v682_v31, %v682_v31 }
 0x148   : > { %v686_v28 = vsub.f32 %v684_v26, %v685_v27 }
 0x14a   : > { %v687_v33 = vadd.f32 1e-05, %v686_v28 }
 0x14c   : > { %1023 = vrsqrt.f32 %v687_v33  ;;  %vm694_vm3 = vweird.f32 %v687_v33 }
 0x152   : > { %v1024_v54 = vpop.eup %1023 }
 0x153   : > { %v689_v34 = vmul.f32 %v1024_v54, %v687_v33  ;;  %vm695_vm4 = vweird.f32 %v1024_v54 }
 0x154   : > { %vm696_vm5 = vmor %vm694_vm3, %vm695_vm4 }
 0x155   : > { %v690_v35 = vmul.f32 %v1024_v54, %v689_v34 }
 0x157   : > { %v691_v36 = vmul.f32 0.5, %v690_v35 }
 0x159   : > { %v692_v37 = vsub.f32 1.5, %v691_v36 }
 0x15b   : > { %v693_v60 = vmul.f32 %v1024_v54, %v692_v37 }
 0x15d   : > { %v697_v39 = vsel %vm696_vm5, %v1024_v54, %v693_v60 }
 0x15e   : > { %v699_v40 = vmul.f32 %v698_v38, %v697_v39 }
 0x160   : > { %700 = vst.msk [vmem:[#allocation12] sm:$0x3] %vm1500_vm2, %v699_v40  ;;  %v702_v42 = vmul.f32 %v699_v40, %v682_v31 }
 0x162   : > { %v703_v43 = vsub.f32 %v701_v41, %v702_v42 }
 0x164   : > { %704 = vst.msk [vmem:[#allocation13] sm:$0x3] %vm1500_vm2, %v703_v43 }
 0x165 PF: > { %p979_p4 = scmp.eq.s32.totalorder %s1315_s25, 1  ;;  %s1259_s13 = smov [#allocation12]  }
 0x166   : > { %s711_s14 = sshll.u32 %s1259_s13, 4  ;;  %s713_s19 = sshll.u32 %s1553_s5, 4  ;;  %s712_s14 = int_to_ptr.vmem [resolvable:$true] %s711_s14  ;;  %s714_s19 = int_to_ptr.hbm [resolvable:$true] %s713_s19 }
 0x167   : > { %951 = dma.vmem_to_hbm [thread:$0]  (%p979_p4), %s712_s14, 32, %s714_s19, [#allocation6]  }
 0x168   : > { %s725_s28 = sshll.u32 %s1554_s6, 4  ;;  %s1260_s24 = smov [#allocation13]   ;;  %s726_s28 = int_to_ptr.hbm [resolvable:$true] %s725_s28 }
 0x169   : > { %s723_s29 = sshll.u32 %s1260_s24, 4  ;;  %s724_s29 = int_to_ptr.vmem [resolvable:$true] %s723_s29 }
 0x16a   : > { %953 = dma.vmem_to_hbm [thread:$0]  (%p979_p4), %s724_s29, 32, %s726_s28, [#allocation14]  }
 0x16b   : > { %1230 = dma.done.wait (%p979_p4), [#allocation6], 32  }
 0x16c   : > { %1232 = vsyncadd (%p979_p4), [#allocation6], 4294967264 }
 0x16d   : > { %1234 = dma.done.wait (%p979_p4), [#allocation14], 32  }
 0x16e   : > { %1236 = vsyncadd (%p979_p4), [#allocation14], 4294967264 }
 0x16f PF: > { %p21_p5 = scmp.ge.s32.totalorder %s1357_s27, 4   ;;  %s1561_s21 = smov %s1243_s22 }
 0x170   : > { %s1562_s22 = smov %s1247_s23  ;;  %s1563_s23 = smov %s1369_s7 }
 0x171   : > { %s1564_s24 = smov %s1357_s27  ;;  %23 = sbr.rel (!%p21_p5) target bundleno = 7 (0x7), region = 105 }
 0x176   :  { %744 = vsyncpa [#allocation5], 1 }
 0x177   :  { %746 = vsyncpa [#allocation5 + $0x1], 1 }
 0x178   :  { %747 = vsyncpa [#allocation8], 1 }
 0x179   :  { %748 = vsyncpa [#allocation11], 1 }
 0x17a   :  { %749 = vsyncpa [#allocation6], 1 }
 0x17b   :  { %751 = vsyncpa [#allocation6 + $0x1], 1 }
 0x17c   :  { %752 = vsyncpa [#allocation14], 1 }

</bundles_post_ra>
